<compile_context>
chip_gen: v7x
topology: tpu7x:2x2x1
jax: 0.10.0
libtpu: 0.0.40
codegen_flags: <defaults>
</compile_context>

<pallas_src>
import functools

import jax
import jax.numpy as jnp
from jax.experimental import pallas as pl
from jax.experimental.pallas import tpu as pltpu


def _round_up(x, m):
    return ((x + m - 1) // m) * m


# ---------------------------------------------------------------------------
# Kernels
# ---------------------------------------------------------------------------
def _conv_block_kernel(x_ref, w1_ref, b1_ref, w2_ref, b2_ref, o_ref):
    """Fused path: full out_dim resident, one batch tile per grid step."""
    # Stage 1: Conv1d(kernel_size=1) on length-1 seq == x @ W1t + b1.
    # Cast in-kernel (VPU, hidden under MXU) instead of a wrapper HBM pass.
    x = x_ref[...].astype(w1_ref.dtype)
    h = jnp.dot(x, w1_ref[...], preferred_element_type=jnp.float32)
    h = jnp.tanh(h + b1_ref[...])                                # f32 epilogue
    # Stage 2: Dense == h @ W2t + b2.
    y = jnp.dot(h.astype(w2_ref.dtype), w2_ref[...],
                preferred_element_type=jnp.float32)
    o_ref[...] = jnp.tanh(y + b2_ref[...]).astype(o_ref.dtype)


def _conv_block_kernel_ntiled(x_ref, w1_ref, b1_ref, w2_ref, b2_ref, o_ref,
                              h_ref):
    """out_dim-tiled path: W2 streamed in column tiles along grid axis j.

    Stage-1 h is computed once per batch tile (at j == 0) into VMEM scratch
    and reused for every N tile (j axis is 'arbitrary', iterated innermost).
    """
    @pl.when(pl.program_id(1) == 0)
    def _():
        x = x_ref[...].astype(w1_ref.dtype)
        h = jnp.dot(x, w1_ref[...], preferred_element_type=jnp.float32)
        h_ref[...] = jnp.tanh(h + b1_ref[...])

    y = jnp.dot(h_ref[...].astype(w2_ref.dtype), w2_ref[...],
                preferred_element_type=jnp.float32)
    o_ref[...] = jnp.tanh(y + b2_ref[...]).astype(o_ref.dtype)


# ---------------------------------------------------------------------------
# Wrapper
# ---------------------------------------------------------------------------
@functools.partial(jax.jit,
                   static_argnames=("block_b", "block_n", "compute_dtype",
                                    "out_dtype"))
def conv_block_forward(x, w1, b1, w2, b2, *, block_b=512, block_n=None,
                       compute_dtype=jnp.bfloat16, out_dtype=None):
    """x: (B, in_dim, 1); w1: (out_dim, in_dim); w2: (out_dim, out_dim).

    Returns (B, out_dim, 1).  `compute_dtype` is the MXU-feed dtype (bf16
    default; accumulation, bias add and tanh stay f32).  `out_dtype` defaults
    to x.dtype.  `block_n` forces out_dim tiling (must be a multiple of 128);
    by default it is enabled automatically when a resident W2 would be large.
    """
    B, in_dim, L = x.shape
    assert L == 1, "Conv_Block.forward squeezes dim 2, so L must be 1"
    out_dim = w1.shape[0]
    if out_dtype is None:
        out_dtype = x.dtype

    x_ds = jnp.dtype(x.dtype).itemsize
    o_ds = jnp.dtype(out_dtype).itemsize
    c_ds = jnp.dtype(compute_dtype).itemsize

    # ---- lane-friendly feature padding (full MXU lanes, lane-dense stores) -
    in_p = _round_up(in_dim, 128)
    if block_n is not None:
        assert block_n % 128 == 0, "block_n must be a multiple of 128"
        out_p = _round_up(out_dim, block_n)
        tn = block_n
    else:
        out_p = _round_up(out_dim, 128)
        tn = out_p
        # Stream W2 by column tiles once keeping it resident would strain
        # VMEM (v7x: 64 MiB per TC, 32 MiB default scoped).
        if out_p * out_p * c_ds > (12 << 20):
            for cand in (512, 256, 128):
                if out_p % cand == 0:
                    tn = cand
                    break
    ntiled = tn != out_p

    # ---- batch tile --------------------------------------------------------
    b16 = _round_up(B, 16)                       # sublane-safe for f32 & bf16
    tb = min(_round_up(block_b, 16), b16)
    # Keep >=2 batch steps when B allows it: v7x megacore shards the
    # 'parallel' batch axis across its 2 TCs, and >=2 steps lets the x/out
    # DMAs overlap compute.
    steps = max(2, pl.cdiv(b16, tb)) if b16 >= 32 else 1
    # Cap tb so the double-buffered x/out tiles (+ h scratch) stay ~<=16 MiB.
    per_row = 2 * (in_p * x_ds + (tn if ntiled else out_p) * o_ds)
    if ntiled:
        per_row += out_p * 4                     # f32 h scratch
    tb_cap = max(16, ((16 << 20) // per_row) // 16 * 16)
    tb = min(_round_up(pl.cdiv(b16, steps), 16), tb_cap)
    steps = pl.cdiv(b16, tb)
    b_p = steps * tb

    # ---- operand prep (skip HBM passes when shapes are already aligned) ----
    x2d = x.reshape(B, in_dim)                   # free reshape; dtype untouched
    if b_p != B or in_p != in_dim:
        x2d = jnp.pad(x2d, ((0, b_p - B), (0, in_p - in_dim)))

    # Pre-transposed, contraction-major [K, N] weights (one-time cost).
    w1t = w1.T.astype(compute_dtype)
    w2t = w2.T.astype(compute_dtype)
    if in_p != in_dim or out_p != out_dim:
        w1t = jnp.pad(w1t, ((0, in_p - in_dim), (0, out_p - out_dim)))
    if out_p != out_dim:
        w2t = jnp.pad(w2t, ((0, out_p - out_dim), (0, out_p - out_dim)))
    # Biases stay f32 for the f32 epilogue; padded lanes give tanh(0)=0 which
    # only ever multiplies zero rows of the padded W2t, so no contamination.
    b1p = b1.astype(jnp.float32).reshape(1, -1)
    b2p = b2.astype(jnp.float32).reshape(1, -1)
    if out_p != out_dim:
        b1p = jnp.pad(b1p, ((0, 0), (0, out_p - out_dim)))
        b2p = jnp.pad(b2p, ((0, 0), (0, out_p - out_dim)))

    resident = pl.Buffered(1)   # grid-invariant operands: single VMEM buffer

    if not ntiled:
        grid = (b_p // tb,)
        in_specs = [
            pl.BlockSpec((tb, in_p), lambda i: (i, 0)),
            pl.BlockSpec((in_p, out_p), lambda i: (0, 0),
                         pipeline_mode=resident),
            pl.BlockSpec((1, out_p), lambda i: (0, 0),
                         pipeline_mode=resident),
            pl.BlockSpec((out_p, out_p), lambda i: (0, 0),
                         pipeline_mode=resident),
            pl.BlockSpec((1, out_p), lambda i: (0, 0),
                         pipeline_mode=resident),
        ]
        out_specs = pl.BlockSpec((tb, out_p), lambda i: (i, 0))
        scratch = []
        kernel = _conv_block_kernel
        dims = ("parallel",)
        need = (2 * tb * in_p * x_ds + 2 * tb * out_p * o_ds
                + (in_p * out_p + out_p * out_p) * c_ds + 2 * out_p * 4)
    else:
        grid = (b_p // tb, out_p // tn)
        in_specs = [
            pl.BlockSpec((tb, in_p), lambda i, j: (i, 0)),
            pl.BlockSpec((in_p, out_p), lambda i, j: (0, 0),
                         pipeline_mode=resident),
            pl.BlockSpec((1, out_p), lambda i, j: (0, 0),
                         pipeline_mode=resident),
            pl.BlockSpec((out_p, tn), lambda i, j: (0, j)),   # W2 column tiles
            pl.BlockSpec((1, tn), lambda i, j: (0, j)),
        ]
        out_specs = pl.BlockSpec((tb, tn), lambda i, j: (i, j))
        scratch = [pltpu.VMEM((tb, out_p), jnp.float32)]      # stage-1 h
        kernel = _conv_block_kernel_ntiled
        dims = ("parallel", "arbitrary")
        need = (2 * tb * in_p * x_ds + 2 * tb * tn * o_ds
                + in_p * out_p * c_ds + 2 * out_p * tn * c_ds
                + (out_p + 2 * tn) * 4 + tb * out_p * 4)

    vmem_limit = int(min(64 << 20, max(32 << 20, int(need * 1.25) + (2 << 20))))

    y2d = pl.pallas_call(
        kernel,
        out_shape=jax.ShapeDtypeStruct((b_p, out_p), out_dtype),
        grid_spec=pltpu.PrefetchScalarGridSpec(
            num_scalar_prefetch=0,
            grid=grid,
            in_specs=in_specs,
            out_specs=out_specs,
            scratch_shapes=scratch,
        ),
        compiler_params=pltpu.CompilerParams(
            dimension_semantics=dims,
            vmem_limit_bytes=vmem_limit,
        ),
    )(x2d, w1t, b1p, w2t, b2p)

    if b_p != B or out_p != out_dim:
        y2d = y2d[:B, :out_dim]
    return y2d.reshape(B, out_dim, 1)


def init_params(key, in_dim, out_dim):
    """Deterministic PyTorch-style uniform(-1/sqrt(fan_in), 1/sqrt(fan_in))."""
    k1, k2, k3, k4 = jax.random.split(key, 4)
    bound1 = 1.0 / jnp.sqrt(in_dim)
    bound2 = 1.0 / jnp.sqrt(out_dim)
    w1 = jax.random.uniform(k1, (out_dim, in_dim), jnp.float32, -bound1, bound1)
    b1 = jax.random.uniform(k2, (out_dim,), jnp.float32, -bound1, bound1)
    w2 = jax.random.uniform(k3, (out_dim, out_dim), jnp.float32, -bound2, bound2)
    b2 = jax.random.uniform(k4, (out_dim,), jnp.float32, -bound2, bound2)
    return w1, b1, w2, b2


if __name__ == "__main__":
    key = jax.random.PRNGKey(0)
    k_x, k_p, k_x2, k_p2 = jax.random.split(key, 4)

    # ---- small case, fused kernel -----------------------------------------
    B, in_dim, out_dim = 2, 8, 16
    x = jax.random.normal(k_x, (B, in_dim, 1), dtype=jnp.float32)
    w1, b1, w2, b2 = init_params(k_p, in_dim, out_dim)

    # Reference in plain JAX (same math as the PyTorch module).
    ref = jnp.tanh(jnp.tanh(x[:, :, 0] @ w1.T + b1) @ w2.T + b2)[:, :, None]

    # f32 MXU feed: exact-tolerance parity with the reference.
    out_f32 = jax.block_until_ready(
        conv_block_forward(x, w1, b1, w2, b2, compute_dtype=jnp.float32))
    assert out_f32.shape == (B, out_dim, 1)
    assert jnp.allclose(out_f32, ref, atol=1e-5, rtol=1e-5)

    # Default bf16 MXU feed (f32 accumulate + epilogue): fast path.
    out_bf16 = jax.block_until_ready(conv_block_forward(x, w1, b1, w2, b2))
    assert out_bf16.shape == (B, out_dim, 1)
    assert jnp.allclose(out_bf16, ref, atol=6e-2)

    # ---- exercise the out_dim-tiled (W2-streaming) kernel path -------------
    B2, in_dim2, out_dim2 = 64, 48, 256
    x2 = jax.random.normal(k_x2, (B2, in_dim2, 1), dtype=jnp.float32)
    w1b, b1b, w2b, b2b = init_params(k_p2, in_dim2, out_dim2)
    ref2 = jnp.tanh(jnp.tanh(x2[:, :, 0] @ w1b.T + b1b) @ w2b.T + b2b)[:, :, None]
    out2 = jax.block_until_ready(
        conv_block_forward(x2, w1b, b1b, w2b, b2b,
                           compute_dtype=jnp.float32, block_b=32, block_n=128))
    assert out2.shape == (B2, out_dim2, 1)
    assert jnp.allclose(out2, ref2, atol=1e-5, rtol=1e-5)

    print("KERNEL_OK")
</pallas_src>

<mosaic_0001>
module attributes {stable_mosaic.version = 11 : i64} {
  func.func @_conv_block_kernel(%arg0: i32, %arg1: memref<16x128xf32, #tpu.memory_space<vmem>>, %arg2: memref<128x128xf32, #tpu.memory_space<vmem>>, %arg3: memref<1x128xf32, #tpu.memory_space<vmem>>, %arg4: memref<128x128xf32, #tpu.memory_space<vmem>>, %arg5: memref<1x128xf32, #tpu.memory_space<vmem>>, %arg6: memref<16x128xf32, #tpu.memory_space<vmem>>) attributes {dimension_semantics = [#tpu.dimension_semantics<parallel>], iteration_bounds = array<i64: 1>, scalar_prefetch = 0 : i64, scratch_operands = 0 : i64, tpu.core_type = #tpu.core_type<tc>, window_params = [{transform_indices = @transform_0, window_bounds = array<i64: 16, 128>}, {pipeline_mode = #tpu.pipeline_mode<synchronous>, transform_indices = @transform_1, window_bounds = array<i64: 128, 128>}, {pipeline_mode = #tpu.pipeline_mode<synchronous>, transform_indices = @transform_2, window_bounds = array<i64: 1, 128>}, {pipeline_mode = #tpu.pipeline_mode<synchronous>, transform_indices = @transform_3, window_bounds = array<i64: 128, 128>}, {pipeline_mode = #tpu.pipeline_mode<synchronous>, transform_indices = @transform_4, window_bounds = array<i64: 1, 128>}, {transform_indices = @transform_5, window_bounds = array<i64: 16, 128>}]} {
    %c0 = arith.constant 0 : index
    %c0_0 = arith.constant 0 : index
    %0 = vector.load %arg1[%c0, %c0_0] : memref<16x128xf32, #tpu.memory_space<vmem>>, vector<16x128xf32>
    %c0_1 = arith.constant 0 : index
    %c0_2 = arith.constant 0 : index
    %1 = vector.load %arg2[%c0_1, %c0_2] : memref<128x128xf32, #tpu.memory_space<vmem>>, vector<128x128xf32>
    %cst = arith.constant dense<0.000000e+00> : vector<16x128xf32>
    %2 = tpu.matmul %0, %1, %cst {dimension_numbers = #tpu.dot_dimension_numbers<[1], [0], [0], [1], [0, 0, 1, 1], [], []>} : vector<16x128xf32>, vector<128x128xf32>, vector<16x128xf32> -> vector<16x128xf32>
    %c0_3 = arith.constant 0 : index
    %c0_4 = arith.constant 0 : index
    %3 = vector.load %arg3[%c0_3, %c0_4] : memref<1x128xf32, #tpu.memory_space<vmem>>, vector<1x128xf32>
    %4 = vector.broadcast %3 : vector<1x128xf32> to vector<16x128xf32>
    %5 = arith.addf %2, %4 : vector<16x128xf32>
    %6 = math.tanh %5 : vector<16x128xf32>
    %c0_5 = arith.constant 0 : index
    %c0_6 = arith.constant 0 : index
    %7 = vector.load %arg4[%c0_5, %c0_6] : memref<128x128xf32, #tpu.memory_space<vmem>>, vector<128x128xf32>
    %cst_7 = arith.constant dense<0.000000e+00> : vector<16x128xf32>
    %8 = tpu.matmul %6, %7, %cst_7 {dimension_numbers = #tpu.dot_dimension_numbers<[1], [0], [0], [1], [0, 0, 1, 1], [], []>} : vector<16x128xf32>, vector<128x128xf32>, vector<16x128xf32> -> vector<16x128xf32>
    %c0_8 = arith.constant 0 : index
    %c0_9 = arith.constant 0 : index
    %9 = vector.load %arg5[%c0_8, %c0_9] : memref<1x128xf32, #tpu.memory_space<vmem>>, vector<1x128xf32>
    %10 = vector.broadcast %9 : vector<1x128xf32> to vector<16x128xf32>
    %11 = arith.addf %8, %10 : vector<16x128xf32>
    %12 = math.tanh %11 : vector<16x128xf32>
    %c0_10 = arith.constant 0 : index
    %c0_11 = arith.constant 0 : index
    %13 = vector.load %arg6[%c0_10, %c0_11] : memref<16x128xf32, #tpu.memory_space<vmem>>, vector<16x128xf32>
    tpu.vector_store %arg6[%c0_10, %c0_11], %12 {strides = array<i32>} : memref<16x128xf32, #tpu.memory_space<vmem>>, vector<16x128xf32>,
    return
  }
  func.func @transform_0(%arg0: i32) -> (i32, i32) {
    %c0_i32 = arith.constant 0 : i32
    %c0_i32_0 = arith.constant 0 : i32
    return %arg0, %c0_i32 : i32, i32
  }
  func.func @transform_1(%arg0: i32) -> (i32, i32) {
    %c0_i32 = arith.constant 0 : i32
    %c0_i32_0 = arith.constant 0 : i32
    %c0_i32_1 = arith.constant 0 : i32
    return %c0_i32, %c0_i32_0 : i32, i32
  }
  func.func @transform_2(%arg0: i32) -> (i32, i32) {
    %c0_i32 = arith.constant 0 : i32
    %c0_i32_0 = arith.constant 0 : i32
    %c0_i32_1 = arith.constant 0 : i32
    return %c0_i32, %c0_i32_0 : i32, i32
  }
  func.func @transform_3(%arg0: i32) -> (i32, i32) {
    %c0_i32 = arith.constant 0 : i32
    %c0_i32_0 = arith.constant 0 : i32
    %c0_i32_1 = arith.constant 0 : i32
    return %c0_i32, %c0_i32_0 : i32, i32
  }
  func.func @transform_4(%arg0: i32) -> (i32, i32) {
    %c0_i32 = arith.constant 0 : i32
    %c0_i32_0 = arith.constant 0 : i32
    %c0_i32_1 = arith.constant 0 : i32
    return %c0_i32, %c0_i32_0 : i32, i32
  }
  func.func @transform_5(%arg0: i32) -> (i32, i32) {
    %c0_i32 = arith.constant 0 : i32
    %c0_i32_0 = arith.constant 0 : i32
    return %arg0, %c0_i32 : i32, i32
  }
}

</mosaic_0001>

<bundles_post_ra>
// kernel: conv_block_forward.1
= control target key start
LH: loop header
LB: loop body
LE: loop exit
PB: predicated region body
PF: predicated region fallthrough
CT: control target
= control target key end

     0   :  { %s552_s1 = inlined_call_operand.vmem [shape: f32[128,128], index: 1, kind: input, shape index: {}]   ;;  %s553_s0 = inlined_call_operand.vmem [shape: f32[16,128], index: 0, kind: input, shape index: {}]   ;;  %s554_s3 = inlined_call_operand.vmem [shape: f32[128,128], index: 3, kind: input, shape index: {}]   ;;  %s555_s2 = inlined_call_operand.vmem [shape: f32[1,128], index: 2, kind: input, shape index: {}]   ;;  %s556_s4 = inlined_call_operand.vmem [shape: f32[1,128], index: 4, kind: input, shape index: {}]   ;;  %s557_s5 = inlined_call_operand.vmem [shape: f32[16,128], index: 5, kind: output, shape index: {}]  }
   0x1   :  { %v22_v0 = vld [vmem:[%s552_s1] sm:$0xff]  ;;  %v23_v1 = vld [vmem:[%s552_s1 + $0x8] sm:$0xff]  ;;  %v24_v2 = vld [vmem:[%s552_s1 + $0x10] sm:$0xff] }
   0x2   :  { %v336_v3 = vpack.c.bf16 %v23_v1, %v22_v0  ;;  %v25_v4 = vld [vmem:[%s552_s1 + $0x18] sm:$0xff]  ;;  %v26_v6 = vld [vmem:[%s552_s1 + $0x20] sm:$0xff]  ;;  %v27_v7 = vld [vmem:[%s552_s1 + $0x28] sm:$0xff] }
   0x3   :  { %v340_v5 = vpack.c.bf16 %v25_v4, %v24_v2  ;;  %v344_v8 = vpack.c.bf16 %v27_v7, %v26_v6  ;;  %v28_v9 = vld [vmem:[%s552_s1 + $0x30] sm:$0xff]  ;;  %v29_v10 = vld [vmem:[%s552_s1 + $0x38] sm:$0xff]  ;;  %v20_v11 = vld [vmem:[%s553_s0] sm:$0xff] }
   0x4   :  { %337 = vmatprep.subr.bf16.mxu0 %v336_v3  ;;  %298 = vmatprep.mubr.f32.mxu0 %v20_v11  ;;  %v122_v12 = vld [vmem:[%s554_s3] sm:$0xff]  ;;  %v123_v13 = vld [vmem:[%s554_s3 + $0x8] sm:$0xff]  ;;  %v124_v14 = vld [vmem:[%s554_s3 + $0x10] sm:$0xff]  ;;  %v348_v20 = vpack.c.bf16 %v29_v10, %v28_v9 }
   0x5   :  { %339 = vmatpush3.bf16.msra.mxu0 %v336_v3  ;;  %v368_v15 = vpack.c.bf16 %v123_v13, %v122_v12  ;;  %v125_v16 = vld [vmem:[%s554_s3 + $0x18] sm:$0xff]  ;;  %v126_v18 = vld [vmem:[%s554_s3 + $0x20] sm:$0xff]  ;;  %v127_v19 = vld [vmem:[%s554_s3 + $0x28] sm:$0xff] }
   0x6   :  { %341 = vmatprep.subr.bf16.mxu0 %v340_v5  ;;  %v372_v17 = vpack.c.bf16 %v125_v16, %v124_v14  ;;  %v30_v21 = vld [vmem:[%s552_s1 + $0x40] sm:$0xff]  ;;  %v31_v22 = vld [vmem:[%s552_s1 + $0x48] sm:$0xff]  ;;  %v376_v23 = vpack.c.bf16 %v127_v19, %v126_v18  ;;  %v128_v24 = vld [vmem:[%s554_s3 + $0x30] sm:$0xff] }
   0x7   :  { %369 = vmatprep.subr.bf16.mxu1 %v368_v15  ;;  %v129_v25 = vld [vmem:[%s554_s3 + $0x38] sm:$0xff]  ;;  %v352_v26 = vpack.c.bf16 %v31_v22, %v30_v21  ;;  %v32_v27 = vld [vmem:[%s552_s1 + $0x50] sm:$0xff]  ;;  %v34_v31 = vld [vmem:[%s552_s1 + $0x60] sm:$0xff] }
   0x8   :  { %371 = vmatpush3.bf16.msra.mxu1 %v368_v15  ;;  %v33_v28 = vld [vmem:[%s552_s1 + $0x58] sm:$0xff]  ;;  %v380_v29 = vpack.c.bf16 %v129_v25, %v128_v24  ;;  %v35_v32 = vld [vmem:[%s552_s1 + $0x68] sm:$0xff]  ;;  %v36_v34 = vld [vmem:[%s552_s1 + $0x70] sm:$0xff] }
   0x9   :  { %343 = vmatpush3.bf16.msra.mxu0 %v340_v5  ;;  %373 = vmatprep.subr.bf16.mxu1 %v372_v17  ;;  %v356_v30 = vpack.c.bf16 %v33_v28, %v32_v27  ;;  %v360_v33 = vpack.c.bf16 %v35_v32, %v34_v31  ;;  %v37_v35 = vld [vmem:[%s552_s1 + $0x78] sm:$0xff]  ;;  %v21_v37 = vld [vmem:[%s553_s0 + $0x8] sm:$0xff]  ;;  %v130_v38 = vld [vmem:[%s554_s3 + $0x40] sm:$0xff] }
   0xa   :  { %345 = vmatprep.subr.bf16.mxu0 %v344_v8  ;;  %v364_v36 = vpack.c.bf16 %v37_v35, %v36_v34  ;;  %v131_v39 = vld [vmem:[%s554_s3 + $0x48] sm:$0xff]  ;;  %v132_v41 = vld [vmem:[%s554_s3 + $0x50] sm:$0xff]  ;;  %v133_v42 = vld [vmem:[%s554_s3 + $0x58] sm:$0xff] }
   0xb   :  { %v384_v40 = vpack.c.bf16 %v131_v39, %v130_v38  ;;  %v388_v43 = vpack.c.bf16 %v133_v42, %v132_v41  ;;  %v134_v44 = vld [vmem:[%s554_s3 + $0x60] sm:$0xff]  ;;  %v135_v45 = vld [vmem:[%s554_s3 + $0x68] sm:$0xff]  ;;  %v136_v46 = vld [vmem:[%s554_s3 + $0x70] sm:$0xff] }
   0xc   :  { %375 = vmatpush3.bf16.msra.mxu1 %v372_v17  ;;  %v392_v47 = vpack.c.bf16 %v135_v45, %v134_v44  ;;  %v137_v48 = vld [vmem:[%s554_s3 + $0x78] sm:$0xff]  ;;  %v228_v50 = vld [vmem:[%s555_s2] ss:$0 sm:$0xff] }
   0xd   :  { %347 = vmatpush3.bf16.msra.mxu0 %v344_v8  ;;  %377 = vmatprep.subr.bf16.mxu1 %v376_v23  ;;  %v396_v49 = vpack.c.bf16 %v137_v48, %v136_v46  ;;  %v229_v57 = vld [vmem:[%s556_s4] ss:$0 sm:$0xff] }
   0xe   :  { %349 = vmatprep.subr.bf16.mxu0 %v348_v20 }
  0x10   :  { %379 = vmatpush3.bf16.msra.mxu1 %v376_v23 }
  0x11   :  { %351 = vmatpush3.bf16.msra.mxu0 %v348_v20  ;;  %381 = vmatprep.subr.bf16.mxu1 %v380_v29 }
  0x12   :  { %353 = vmatprep.subr.bf16.mxu0 %v352_v26 }
  0x14   :  { %383 = vmatpush3.bf16.msra.mxu1 %v380_v29 }
  0x15   :  { %355 = vmatpush3.bf16.msra.mxu0 %v352_v26  ;;  %385 = vmatprep.subr.bf16.mxu1 %v384_v40 }
  0x16   :  { %357 = vmatprep.subr.bf16.mxu0 %v356_v30 }
  0x18   :  { %387 = vmatpush3.bf16.msra.mxu1 %v384_v40 }
  0x19   :  { %359 = vmatpush3.bf16.msra.mxu0 %v356_v30  ;;  %389 = vmatprep.subr.bf16.mxu1 %v388_v43 }
  0x1a   :  { %361 = vmatprep.subr.bf16.mxu0 %v360_v33 }
  0x1c   :  { %391 = vmatpush3.bf16.msra.mxu1 %v388_v43 }
  0x1d   :  { %363 = vmatpush3.bf16.msra.mxu0 %v360_v33  ;;  %393 = vmatprep.subr.bf16.mxu1 %v392_v47 }
  0x1e   :  { %365 = vmatprep.subr.bf16.mxu0 %v364_v36 }
  0x20   :  { %395 = vmatpush3.bf16.msra.mxu1 %v392_v47 }
  0x21   :  { %367 = vmatpush3.bf16.msra.mxu0 %v364_v36  ;;  %397 = vmatprep.subr.bf16.mxu1 %v396_v49 }
  0x24   :  { %299 = vmatmul.mubr.f32.vlgmr.msra.gmra.mrb[0].mxu0 %v21_v37  ;;  %399 = vmatpush3.bf16.msra.mxu1 %v396_v49 }
  0xf7   :  { %v300_v51 = vpop.f32.mrb[0].mxu0 }
  0xf8   :  { %v117_v52 = vadd.f32 %v300_v51, %v228_v50  ;;  %v111_v53 = vpop.f32.mrb[1].mxu0 }
  0xf9   :  { %v112_v54 = vadd.f32 %v228_v50, %v111_v53 }
  0xfb   :  { %400 = vtanh.f32 %v112_v54 }
  0xfc   :  { %402 = vtanh.f32 %v117_v52 }
 0x105   :  { %v401_v55 = vpop.eup %400 }
 0x106   :  { %v403_v56 = vpop.eup %402  ;;  %333 = vmatprep.mubr.f32.mxu1 %v401_v55 }
 0x107   :  { %334 = vmatmul.mubr.f32.vlgmr.msra.gmra.mrb[0].mxu1 %v403_v56 }
 0x1da   :  { %v335_v58 = vpop.f32.mrb[0].mxu1 }
 0x1db   :  { %v217_v59 = vadd.f32 %v335_v58, %v229_v57  ;;  %v211_v60 = vpop.f32.mrb[1].mxu1 }
 0x1dc   :  { %v212_v61 = vadd.f32 %v229_v57, %v211_v60 }
 0x1dd   :  { %404 = vtanh.f32 %v217_v59 }
 0x1de   :  { %406 = vtanh.f32 %v212_v61 }
 0x1e7   :  { %v405_v62 = vpop.eup %404 }
 0x1e8   :  { %v407_v63 = vpop.eup %406  ;;  %223 = vst [vmem:[%s557_s5 + $0x8] sm:$0xff] %v405_v62 }
 0x1e9   :  { %222 = vst [vmem:[%s557_s5] sm:$0xff] %v407_v63 }

</bundles_post_ra>
